<compile_context>
chip_gen: v5e
topology: v5e:2x2
jax: 0.10.0
libtpu: 0.0.40
codegen_flags: <defaults>
</compile_context>

<pallas_src>
import math
import functools

import jax
import jax.numpy as jnp
from jax import lax
from jax.experimental import pallas as pl
from jax.experimental.pallas import tpu as pltpu

_NEG = -1.0e30     # plain Python float -> jaxpr literal (finite: no NaN for masked cols)
_LANE = 128


def _round_up(a, m):
    return (a + m - 1) // m * m


def temporal_block_kernel(x_ref, wqkv_ref, w1_ref, w2_ref, b_ref, o_ref, *scratch,
                          t_valid, key_block, kernel_size, dilation,
                          inv_sqrt_key_size, kp, compute_dtype):
    cdt = compute_dtype
    x = x_ref[...]                                    # (BB, Tp, Cp) f32
    BB, Tp, Cp = x.shape
    Kp = kp
    TK = key_block
    num_kb = Tp // TK

    b_all = b_ref[...]                                # (3, 2*Kp+Cp) f32: one DMA
    bqkv = b_all[0:1, :]
    b1 = b_all[1:2, :Cp]
    b2 = b_all[2:3, :Cp]

    # ----- fused q/k/v projection: a single big MXU matmul -------------------------
    x2 = x.astype(cdt).reshape(BB * Tp, Cp)
    qkv = jnp.dot(x2, wqkv_ref[...], preferred_element_type=jnp.float32) + bqkv
    # fold 1/sqrt(key_size) into q instead of scaling the (T, T) scores
    qc = (qkv[:, :Kp] * inv_sqrt_key_size).reshape(BB, Tp, Kp).astype(cdt)
    k = qkv[:, Kp:2 * Kp].reshape(BB, Tp, Kp).astype(cdt)   # values in compute dtype:
    v = qkv[:, 2 * Kp:].reshape(BB, Tp, Cp).astype(cdt)     # no f32 scratch round trip

    # ----- attention, tiled over keys, restricted to the causal query slab ----------
    # Softmax is over the QUERY axis (PyTorch dim=1): each key column is normalized
    # independently, and key block kb only reaches output rows j >= kb*TK.
    def attn_block(kb):
        i0 = kb * TK
        slab = Tp - i0
        q_s = qc[:, i0:, :]                            # (BB, slab, Kp)
        k_b = k[:, i0:i0 + TK, :]                      # (BB, TK, Kp)
        v_b = v[:, i0:i0 + TK, :]                      # (BB, TK, Cp)
        s = jnp.einsum('bjd,bid->bji', q_s, k_b,
                       preferred_element_type=jnp.float32)     # (BB, slab, TK)
        jl = lax.broadcasted_iota(jnp.int32, (slab, TK), 0)    # local query index
        il = lax.broadcasted_iota(jnp.int32, (slab, TK), 1)    # local key index
        keep = (il <= jl) & (jl + i0 < t_valid)                # causal + padded rows
        s = jnp.where(keep, s, _NEG)                           # finite mask, f32
        m = jnp.max(s, axis=1, keepdims=True)                  # softmax over queries
        e = jnp.exp(s - m)
        p = e / jnp.sum(e, axis=1, keepdims=True)
        if i0 + TK > t_valid:                # only the last block has padded key cols;
            p = jnp.where(il + i0 < t_valid, p, 0.0)   # required for row_sum / en_res
        contrib = jnp.einsum('bji,bic->bjc', p.astype(cdt), v_b,
                             preferred_element_type=jnp.float32)
        return contrib, jnp.sum(p, axis=2, keepdims=True)

    c0, r0 = attn_block(0)
    if num_kb == 1:
        out_attn, row_sum = c0, r0
    else:
        acc_ref, rsum_ref = scratch
        acc_ref[...] = c0
        rsum_ref[...] = r0
        for kb in range(1, num_kb):                    # static unroll, static slabs
            i0 = kb * TK
            c, r = attn_block(kb)
            acc_ref[:, i0:, :] += c
            rsum_ref[:, i0:, :] += r
        out_attn = acc_ref[...]
        row_sum = rsum_ref[...]

    # ----- causal dilated conv net (2 sub-blocks), channels-last matmul form --------
    def shift_cast(h, shift):            # h[t] -> h[t - shift], zero-filled (causal)
        hc = h.astype(cdt)               # taps built in compute dtype (halves the slab)
        if shift == 0:
            return hc
        if shift >= Tp:
            return jnp.zeros_like(hc)
        zeros = jnp.zeros((BB, shift, Cp), cdt)
        return jnp.concatenate([zeros, hc[:, :Tp - shift, :]], axis=1)

    def causal_conv(h, w_ref, bias):     # fused (T, k*C) @ (k*C, C) matmul per block
        taps = [shift_cast(h, (kernel_size - 1 - j) * dilation)
                for j in range(kernel_size)]
        stacked = jnp.concatenate(taps, axis=-1)       # (BB, Tp, k*Cp) in compute dtype
        out2 = jnp.dot(stacked.reshape(BB * Tp, kernel_size * Cp), w_ref[...],
                       preferred_element_type=jnp.float32) + bias
        return out2.reshape(BB, Tp, Cp)

    h1 = jnp.maximum(causal_conv(out_attn, w1_ref, b1), 0.0)  # Conv+Chomp+ReLU(+Drop=id)
    h2 = jnp.maximum(causal_conv(h1, w2_ref, b2), 0.0)

    # ----- en_res branch: softmax over time of the per-query attention mass ---------
    t_col = lax.broadcasted_iota(jnp.int32, (Tp, 1), 0)
    s_row = jnp.where(t_col < t_valid, row_sum, _NEG)          # mask padded query rows
    mr = jnp.max(s_row, axis=1, keepdims=True)
    er = jnp.exp(s_row - mr)
    weight_x = er / jnp.sum(er, axis=1, keepdims=True)
    en_res_x = weight_x * x

    # downsample is None (n_inputs == n_outputs): res = x
    o_ref[...] = jnp.maximum(h2 + x + en_res_x, 0.0)           # final ReLU


def _vmem_estimate(bb, tp, tk, cp, kp, ksz, cdt_bytes):
    """Rough per-grid-step VMEM residency (bytes) for choosing BB / vmem_limit_bytes."""
    f4 = 4
    w = 2 * kp + cp
    num_kb = tp // tk
    io = 2 * 2 * bb * tp * cp * f4                       # x & out tiles, double-buffered
    wts = 2 * (cp * w + 2 * ksz * cp * cp) * cdt_bytes + 2 * 8 * w * f4
    proj = bb * tp * (cp * cdt_bytes + w * f4 + w * cdt_bytes)
    attn = bb * tp * tk * (3 * f4 + cdt_bytes) + bb * tp * cp * f4
    scr = (bb * tp * cp * f4 + bb * tp * _LANE * f4) if num_kb > 1 else 0
    conv = bb * tp * (ksz * cp * cdt_bytes + 4 * cp * f4)
    return int(1.25 * (io + wts + proj + attn + scr + conv))


def temporal_block(x, params, *, kernel_size, dilation, key_size,
                   block_b=None, key_block=512, fast=True, vmem_budget_mb=28):
    """TemporalBlock forward (temp_attn, nheads=1, en_res, conv, 2 sub-blocks, inference).

    x: (B, T, C) channels-last. Returns (out, attn_weight_cpu_placeholder)."""
    wq, bq, wk, bk, wv, bv, w1, b1, w2, b2 = params
    B, T, C = x.shape
    assert w2.shape[-1] == C, "downsample=None branch requires n_inputs == n_outputs"

    cdt = jnp.bfloat16 if fast else jnp.float32
    f32 = jnp.float32
    Cp = _round_up(C, _LANE)
    Kp = _round_up(key_size, _LANE)
    W = 2 * Kp + Cp

    # time padding / key-block size (Tp is a multiple of TK; TK lane-aligned if tiled)
    if T <= key_block:
        Tp = _round_up(T, 8)
        TK = Tp
    else:
        TK = _round_up(key_block, _LANE)
        Tp = _round_up(T, TK)
    num_kb = Tp // TK

    # batch block sized from the FULL working-set estimate, capped so the grid has
    # at least 2 steps (both v7x TensorCores get work).
    cbytes = 2 if fast else 4
    budget = vmem_budget_mb << 20
    bb_cap = B if B == 1 else -(-B // 2)
    if block_b is None:
        e1 = _vmem_estimate(1, Tp, TK, Cp, Kp, kernel_size, cbytes)
        e2 = _vmem_estimate(2, Tp, TK, Cp, Kp, kernel_size, cbytes)
        per_b = max(1, e2 - e1)
        fixed = max(0, e1 - per_b)
        BB = int(max(1, min(bb_cap, (budget - fixed) // per_b)))
    else:
        BB = max(1, min(block_b, B))
    Bp = _round_up(B, BB)
    est = _vmem_estimate(BB, Tp, TK, Cp, Kp, kernel_size, cbytes)
    vmem_limit = int(min(max(int(est * 1.4), 20 << 20), 48 << 20))

    xp = jnp.pad(x.astype(f32), ((0, Bp - B), (0, Tp - T), (0, Cp - C)))

    def pad2(w_, rows, cols):
        return jnp.pad(w_.astype(f32), ((0, rows - w_.shape[0]), (0, cols - w_.shape[1])))

    # fused, pre-transposed q/k/v weight: one lane-dense (Cp, 2*Kp+Cp) MXU operand
    wqkv = jnp.concatenate([pad2(wq.T, Cp, Kp), pad2(wk.T, Cp, Kp),
                            pad2(wv.T, Cp, Cp)], axis=1).astype(cdt)

    def stack_conv(w_):                   # (k, C_in, C_out) -> (k*Cp, Cp)
        ksz = w_.shape[0]
        wp = jnp.pad(w_.astype(f32),
                     ((0, 0), (0, Cp - w_.shape[1]), (0, Cp - w_.shape[2])))
        return wp.reshape(ksz * Cp, Cp).astype(cdt)

    w1_s = stack_conv(w1)
    w2_s = stack_conv(w2)

    def padw(v_, width):
        v_ = v_.astype(f32).reshape(-1)
        return jnp.pad(v_, (0, width - v_.shape[0]))

    bqkv = jnp.concatenate([padw(bq, Kp), padw(bk, Kp), padw(bv, Cp)])
    biases = jnp.stack([bqkv, padw(b1, W), padw(b2, W)], axis=0)     # (3, W): one DMA

    scratch = ([pltpu.VMEM((BB, Tp, Cp), f32), pltpu.VMEM((BB, Tp, 1), f32)]
               if num_kb > 1 else [])

    kern = functools.partial(
        temporal_block_kernel,
        t_valid=T, key_block=TK, kernel_size=kernel_size, dilation=dilation,
        inv_sqrt_key_size=1.0 / math.sqrt(key_size), kp=Kp, compute_dtype=cdt)

    def whole(a):
        nd = a.ndim
        return pl.BlockSpec(a.shape, lambda b, _nd=nd: (0,) * _nd)

    out_p = pl.pallas_call(
        kern,
        out_shape=jax.ShapeDtypeStruct((Bp, Tp, Cp), f32),
        grid=(Bp // BB,),
        in_specs=[pl.BlockSpec((BB, Tp, Cp), lambda b: (b, 0, 0)),
                  whole(wqkv), whole(w1_s), whole(w2_s), whole(biases)],
        out_specs=pl.BlockSpec((BB, Tp, Cp), lambda b: (b, 0, 0)),
        scratch_shapes=scratch,
        compiler_params=pltpu.CompilerParams(
            dimension_semantics=("parallel",),
            vmem_limit_bytes=vmem_limit),
    )(xp, wqkv, w1_s, w2_s, biases)

    out = out_p[:B, :T, :C]
    attn_weight_cpu = [0] * 10            # visual=False branch of the PyTorch module
    return out, attn_weight_cpu


def reference(x, params, *, kernel_size, dilation, key_size):
    """Pure-JAX reference mirroring the PyTorch forward (for the correctness check)."""
    wq, bq, wk, bk, wv, bv, w1, b1, w2, b2 = params
    B, T, C = x.shape
    q = x @ wq.T + bq
    k = x @ wk.T + bk
    v = x @ wv.T + bv
    scores = jnp.einsum('bjd,bid->bji', q, k)
    mask = jnp.arange(T)[None, :] > jnp.arange(T)[:, None]           # [j, i], i > j
    scores = jnp.where(mask[None], -jnp.inf, scores) / math.sqrt(key_size)
    w = jax.nn.softmax(scores, axis=1)
    out_attn = jnp.einsum('bji,bic->bjc', w, v)

    def conv(h, wt, bt):
        acc = jnp.zeros_like(h) + bt
        for j in range(kernel_size):
            shift = (kernel_size - 1 - j) * dilation
            hp = jnp.pad(h, ((0, 0), (shift, 0), (0, 0)))[:, :T, :]
            acc = acc + jnp.einsum('btc,cd->btd', hp, wt[j])
        return acc

    h1 = jax.nn.relu(conv(out_attn, w1, b1))
    h2 = jax.nn.relu(conv(h1, w2, b2))
    weight_x = jax.nn.softmax(w.sum(axis=2), axis=1)                 # (B, T)
    en_res = weight_x[..., None] * x
    return jax.nn.relu(h2 + x + en_res)


def _make_params(key, n_ch, key_size, kernel_size):
    ks = jax.random.split(key, 10)
    wq = 0.05 * jax.random.normal(ks[0], (key_size, n_ch), jnp.float32)
    bq = 0.05 * jax.random.normal(ks[1], (1, key_size), jnp.float32)
    wk = 0.05 * jax.random.normal(ks[2], (key_size, n_ch), jnp.float32)
    bk = 0.05 * jax.random.normal(ks[3], (1, key_size), jnp.float32)
    wv = 0.05 * jax.random.normal(ks[4], (n_ch, n_ch), jnp.float32)
    bv = 0.05 * jax.random.normal(ks[5], (1, n_ch), jnp.float32)
    # conv weights tap-major (k, C_in, C_out) == transpose of PyTorch (C_out, C_in, k)
    w1 = 0.01 * jax.random.normal(ks[6], (kernel_size, n_ch, n_ch), jnp.float32)
    b1 = 0.01 * jax.random.normal(ks[7], (1, n_ch), jnp.float32)
    w2 = 0.01 * jax.random.normal(ks[8], (kernel_size, n_ch, n_ch), jnp.float32)
    b2 = 0.01 * jax.random.normal(ks[9], (1, n_ch), jnp.float32)
    return (wq, bq, wk, bk, wv, bv, w1, b1, w2, b2)


def _check(B, T, C, key_size, kernel_size, dilation, seed_key, fast, atol):
    kx, kp = jax.random.split(seed_key)
    x = jax.random.normal(kx, (B, T, C), dtype=jnp.float32)
    params = _make_params(kp, C, key_size, kernel_size)
    out, _ = temporal_block(x, params, kernel_size=kernel_size,
                            dilation=dilation, key_size=key_size, fast=fast)
    out = jax.block_until_ready(out)
    ref = jax.block_until_ready(
        reference(x, params, kernel_size=kernel_size, dilation=dilation,
                  key_size=key_size))
    assert out.shape == (B, T, C)
    err = float(jnp.max(jnp.abs(out - ref)))
    assert jnp.allclose(out, ref, atol=atol, rtol=atol), (
        f"max abs err {err} (B={B} T={T} C={C} fast={fast})")


if __name__ == "__main__":
    root = jax.random.PRNGKey(0)
    k1, k2 = jax.random.split(root)

    # Config from the module spec: n_inputs == n_outputs (downsample=None),
    # kernel_size=3, dilation=1, key_size=4, B=2, T=16, C=8.  Exact-f32 path.
    _check(B=2, T=16, C=8, key_size=4, kernel_size=3, dilation=1,
           seed_key=k1, fast=False, atol=1e-4)

    # Odd sizes exercise the T / C / key_size padding + masking paths; dilation=2.
    _check(B=3, T=13, C=5, key_size=3, kernel_size=3, dilation=2,
           seed_key=k2, fast=False, atol=1e-4)

    # bf16 MXU operands (production / performance configuration).
    _check(B=2, T=16, C=8, key_size=4, kernel_size=3, dilation=1,
           seed_key=k1, fast=True, atol=3e-2)

    print("KERNEL_OK")
</pallas_src>

<mosaic_0001>
module attributes {stable_mosaic.version = 11 : i64} {
  func.func @temporal_block_kernel(%arg0: i32, %arg1: memref<1x16x128xf32, #tpu.memory_space<vmem>>, %arg2: memref<128x384xf32, #tpu.memory_space<vmem>>, %arg3: memref<384x128xf32, #tpu.memory_space<vmem>>, %arg4: memref<384x128xf32, #tpu.memory_space<vmem>>, %arg5: memref<3x384xf32, #tpu.memory_space<vmem>>, %arg6: memref<1x16x128xf32, #tpu.memory_space<vmem>>) attributes {dimension_semantics = [#tpu.dimension_semantics<parallel>], iteration_bounds = array<i64: 2>, scalar_prefetch = 0 : i64, scratch_operands = 0 : i64, tpu.core_type = #tpu.core_type<tc>, window_params = [{transform_indices = @transform_0, window_bounds = array<i64: 1, 16, 128>}, {pipeline_mode = #tpu.pipeline_mode<synchronous>, transform_indices = @transform_1, window_bounds = array<i64: 128, 384>}, {pipeline_mode = #tpu.pipeline_mode<synchronous>, transform_indices = @transform_2, window_bounds = array<i64: 384, 128>}, {pipeline_mode = #tpu.pipeline_mode<synchronous>, transform_indices = @transform_3, window_bounds = array<i64: 384, 128>}, {pipeline_mode = #tpu.pipeline_mode<synchronous>, transform_indices = @transform_4, window_bounds = array<i64: 3, 384>}, {transform_indices = @transform_5, window_bounds = array<i64: 1, 16, 128>}]} {
    %c0 = arith.constant 0 : index
    %c0_0 = arith.constant 0 : index
    %c0_1 = arith.constant 0 : index
    %0 = vector.load %arg1[%c0, %c0_0, %c0_1] : memref<1x16x128xf32, #tpu.memory_space<vmem>>, vector<1x16x128xf32>
    %c0_2 = arith.constant 0 : index
    %c0_3 = arith.constant 0 : index
    %1 = vector.load %arg5[%c0_2, %c0_3] : memref<3x384xf32, #tpu.memory_space<vmem>>, vector<3x384xf32>
    %2 = vector.extract_strided_slice %1 {offsets = [0, 0], sizes = [1, 384], strides = [1, 1]} : vector<3x384xf32> to vector<1x384xf32>
    %3 = vector.extract_strided_slice %1 {offsets = [1, 0], sizes = [1, 128], strides = [1, 1]} : vector<3x384xf32> to vector<1x128xf32>
    %4 = vector.extract_strided_slice %1 {offsets = [2, 0], sizes = [1, 128], strides = [1, 1]} : vector<3x384xf32> to vector<1x128xf32>
    %5 = vector.shape_cast %0 : vector<1x16x128xf32> to vector<16x128xf32>
    %c0_4 = arith.constant 0 : index
    %c0_5 = arith.constant 0 : index
    %6 = vector.load %arg2[%c0_4, %c0_5] : memref<128x384xf32, #tpu.memory_space<vmem>>, vector<128x384xf32>
    %cst = arith.constant dense<0.000000e+00> : vector<16x384xf32>
    %7 = tpu.matmul %5, %6, %cst {dimension_numbers = #tpu.dot_dimension_numbers<[1], [0], [0], [1], [0, 0, 1, 1], [], []>} : vector<16x128xf32>, vector<128x384xf32>, vector<16x384xf32> -> vector<16x384xf32>
    %8 = vector.broadcast %2 : vector<1x384xf32> to vector<16x384xf32>
    %9 = arith.addf %7, %8 : vector<16x384xf32>
    %10 = vector.extract_strided_slice %9 {offsets = [0, 0], sizes = [16, 128], strides = [1, 1]} : vector<16x384xf32> to vector<16x128xf32>
    %cst_6 = arith.constant 5.000000e-01 : f32
    %11 = vector.broadcast %cst_6 : f32 to vector<16x128xf32>
    %12 = arith.mulf %10, %11 : vector<16x128xf32>
    %13 = vector.shape_cast %12 : vector<16x128xf32> to vector<1x16x128xf32>
    %14 = vector.extract_strided_slice %9 {offsets = [0, 128], sizes = [16, 128], strides = [1, 1]} : vector<16x384xf32> to vector<16x128xf32>
    %15 = vector.shape_cast %14 : vector<16x128xf32> to vector<1x16x128xf32>
    %16 = vector.extract_strided_slice %9 {offsets = [0, 256], sizes = [16, 128], strides = [1, 1]} : vector<16x384xf32> to vector<16x128xf32>
    %17 = vector.shape_cast %16 : vector<16x128xf32> to vector<1x16x128xf32>
    "tpu.trace_start"() <{level = 10 : i32, message = "bjd,bid->bji"}> : () -> ()
    %cst_7 = arith.constant dense<0.000000e+00> : vector<1x16x16xf32>
    %18 = tpu.matmul %13, %15, %cst_7 {dimension_numbers = #tpu.dot_dimension_numbers<[2], [2], [1], [1], [0, 0, 0, 1, 1, 1], [0], [0]>} : vector<1x16x128xf32>, vector<1x16x128xf32>, vector<1x16x16xf32> -> vector<1x16x16xf32>
    "tpu.trace_stop"() : () -> ()
    %19 = tpu.iota {dimensions = array<i32: 0>} : vector<16x16xi32>
    %20 = tpu.iota {dimensions = array<i32: 1>} : vector<16x16xi32>
    %21 = arith.cmpi sle, %20, %19 : vector<16x16xi32>
    %c0_i32 = arith.constant 0 : i32
    %22 = vector.broadcast %c0_i32 : i32 to vector<16x16xi32>
    %23 = arith.addi %19, %22 : vector<16x16xi32>
    %c16_i32 = arith.constant 16 : i32
    %24 = vector.broadcast %c16_i32 : i32 to vector<16x16xi32>
    %25 = arith.cmpi slt, %23, %24 : vector<16x16xi32>
    %26 = arith.andi %21, %25 : vector<16x16xi1>
    %cst_8 = arith.constant -1.000000e+30 : f32
    %27 = vector.shape_cast %26 : vector<16x16xi1> to vector<1x16x16xi1>
    %28 = vector.broadcast %cst_8 : f32 to vector<1x16x16xf32>
    %29 = arith.select %27, %18, %28 : vector<1x16x16xi1>, vector<1x16x16xf32>
    %cst_9 = arith.constant dense<0xFF800000> : vector<1x16xf32>
    %30 = vector.multi_reduction <maximumf>, %29, %cst_9 [1] : vector<1x16x16xf32> to vector<1x16xf32>
    %31 = vector.shape_cast %30 : vector<1x16xf32> to vector<1x1x16xf32>
    %32 = vector.broadcast %31 : vector<1x1x16xf32> to vector<1x16x16xf32>
    %33 = arith.subf %29, %32 : vector<1x16x16xf32>
    %34 = math.exp %33 : vector<1x16x16xf32>
    %cst_10 = arith.constant dense<0.000000e+00> : vector<1x16xf32>
    %35 = vector.multi_reduction <add>, %34, %cst_10 [1] : vector<1x16x16xf32> to vector<1x16xf32>
    %36 = vector.shape_cast %35 : vector<1x16xf32> to vector<1x1x16xf32>
    %37 = vector.broadcast %36 : vector<1x1x16xf32> to vector<1x16x16xf32>
    %38 = arith.divf %34, %37 : vector<1x16x16xf32>
    "tpu.trace_start"() <{level = 10 : i32, message = "bji,bic->bjc"}> : () -> ()
    %cst_11 = arith.constant dense<0.000000e+00> : vector<1x16x128xf32>
    %39 = tpu.matmul %38, %17, %cst_11 {dimension_numbers = #tpu.dot_dimension_numbers<[2], [1], [1], [2], [0, 0, 0, 1, 1, 2], [0], [0]>} : vector<1x16x16xf32>, vector<1x16x128xf32>, vector<1x16x128xf32> -> vector<1x16x128xf32>
    "tpu.trace_stop"() : () -> ()
    %cst_12 = arith.constant dense<0.000000e+00> : vector<1x16xf32>
    %40 = vector.multi_reduction <add>, %38, %cst_12 [2] : vector<1x16x16xf32> to vector<1x16xf32>
    %41 = vector.shape_cast %40 : vector<1x16xf32> to vector<1x16x1xf32>
    %cst_13 = arith.constant 0.000000e+00 : f32
    %42 = vector.broadcast %cst_13 : f32 to vector<1x2x128xf32>
    %43 = vector.extract_strided_slice %39 {offsets = [0, 0, 0], sizes = [1, 14, 128], strides = [1, 1, 1]} : vector<1x16x128xf32> to vector<1x14x128xf32>
    %44 = tpu.concatenate %42, %43 in 1 : vector<1x2x128xf32>, vector<1x14x128xf32> -> vector<1x16x128xf32>
    %cst_14 = arith.constant 0.000000e+00 : f32
    %45 = vector.broadcast %cst_14 : f32 to vector<1x1x128xf32>
    %46 = vector.extract_strided_slice %39 {offsets = [0, 0, 0], sizes = [1, 15, 128], strides = [1, 1, 1]} : vector<1x16x128xf32> to vector<1x15x128xf32>
    %47 = tpu.concatenate %45, %46 in 1 : vector<1x1x128xf32>, vector<1x15x128xf32> -> vector<1x16x128xf32>
    %48 = tpu.concatenate %44, %47, %39 in 2 : vector<1x16x128xf32>, vector<1x16x128xf32>, vector<1x16x128xf32> -> vector<1x16x384xf32>
    %49 = vector.shape_cast %48 : vector<1x16x384xf32> to vector<16x384xf32>
    %c0_15 = arith.constant 0 : index
    %c0_16 = arith.constant 0 : index
    %50 = vector.load %arg3[%c0_15, %c0_16] : memref<384x128xf32, #tpu.memory_space<vmem>>, vector<384x128xf32>
    %cst_17 = arith.constant dense<0.000000e+00> : vector<16x128xf32>
    %51 = tpu.matmul %49, %50, %cst_17 {dimension_numbers = #tpu.dot_dimension_numbers<[1], [0], [0], [1], [0, 0, 1, 1], [], []>} : vector<16x384xf32>, vector<384x128xf32>, vector<16x128xf32> -> vector<16x128xf32>
    %52 = vector.broadcast %3 : vector<1x128xf32> to vector<16x128xf32>
    %53 = arith.addf %51, %52 : vector<16x128xf32>
    %54 = vector.shape_cast %53 : vector<16x128xf32> to vector<1x16x128xf32>
    %cst_18 = arith.constant 0.000000e+00 : f32
    %55 = vector.broadcast %cst_18 : f32 to vector<1x16x128xf32>
    %56 = arith.maximumf %54, %55 : vector<1x16x128xf32>
    %cst_19 = arith.constant 0.000000e+00 : f32
    %57 = vector.broadcast %cst_19 : f32 to vector<1x2x128xf32>
    %58 = vector.extract_strided_slice %56 {offsets = [0, 0, 0], sizes = [1, 14, 128], strides = [1, 1, 1]} : vector<1x16x128xf32> to vector<1x14x128xf32>
    %59 = tpu.concatenate %57, %58 in 1 : vector<1x2x128xf32>, vector<1x14x128xf32> -> vector<1x16x128xf32>
    %cst_20 = arith.constant 0.000000e+00 : f32
    %60 = vector.broadcast %cst_20 : f32 to vector<1x1x128xf32>
    %61 = vector.extract_strided_slice %56 {offsets = [0, 0, 0], sizes = [1, 15, 128], strides = [1, 1, 1]} : vector<1x16x128xf32> to vector<1x15x128xf32>
    %62 = tpu.concatenate %60, %61 in 1 : vector<1x1x128xf32>, vector<1x15x128xf32> -> vector<1x16x128xf32>
    %63 = tpu.concatenate %59, %62, %56 in 2 : vector<1x16x128xf32>, vector<1x16x128xf32>, vector<1x16x128xf32> -> vector<1x16x384xf32>
    %64 = vector.shape_cast %63 : vector<1x16x384xf32> to vector<16x384xf32>
    %c0_21 = arith.constant 0 : index
    %c0_22 = arith.constant 0 : index
    %65 = vector.load %arg4[%c0_21, %c0_22] : memref<384x128xf32, #tpu.memory_space<vmem>>, vector<384x128xf32>
    %cst_23 = arith.constant dense<0.000000e+00> : vector<16x128xf32>
    %66 = tpu.matmul %64, %65, %cst_23 {dimension_numbers = #tpu.dot_dimension_numbers<[1], [0], [0], [1], [0, 0, 1, 1], [], []>} : vector<16x384xf32>, vector<384x128xf32>, vector<16x128xf32> -> vector<16x128xf32>
    %67 = vector.broadcast %4 : vector<1x128xf32> to vector<16x128xf32>
    %68 = arith.addf %66, %67 : vector<16x128xf32>
    %69 = vector.shape_cast %68 : vector<16x128xf32> to vector<1x16x128xf32>
    %cst_24 = arith.constant 0.000000e+00 : f32
    %70 = vector.broadcast %cst_24 : f32 to vector<1x16x128xf32>
    %71 = arith.maximumf %69, %70 : vector<1x16x128xf32>
    %72 = tpu.iota {dimensions = array<i32: 0>} : vector<16x1xi32>
    %c16_i32_25 = arith.constant 16 : i32
    %73 = vector.broadcast %c16_i32_25 : i32 to vector<16x1xi32>
    %74 = arith.cmpi slt, %72, %73 : vector<16x1xi32>
    %cst_26 = arith.constant -1.000000e+30 : f32
    %75 = vector.shape_cast %74 : vector<16x1xi1> to vector<1x16x1xi1>
    %76 = vector.broadcast %cst_26 : f32 to vector<1x16x1xf32>
    %77 = arith.select %75, %41, %76 : vector<1x16x1xi1>, vector<1x16x1xf32>
    %cst_27 = arith.constant dense<0xFF800000> : vector<1x1xf32>
    %78 = vector.multi_reduction <maximumf>, %77, %cst_27 [1] : vector<1x16x1xf32> to vector<1x1xf32>
    %79 = vector.shape_cast %78 : vector<1x1xf32> to vector<1x1x1xf32>
    %80 = vector.broadcast %79 : vector<1x1x1xf32> to vector<1x16x1xf32>
    %81 = arith.subf %77, %80 : vector<1x16x1xf32>
    %82 = math.exp %81 : vector<1x16x1xf32>
    %cst_28 = arith.constant dense<0.000000e+00> : vector<1x1xf32>
    %83 = vector.multi_reduction <add>, %82, %cst_28 [1] : vector<1x16x1xf32> to vector<1x1xf32>
    %84 = vector.shape_cast %83 : vector<1x1xf32> to vector<1x1x1xf32>
    %85 = vector.broadcast %84 : vector<1x1x1xf32> to vector<1x16x1xf32>
    %86 = arith.divf %82, %85 : vector<1x16x1xf32>
    %87 = vector.broadcast %86 : vector<1x16x1xf32> to vector<1x16x128xf32>
    %88 = arith.mulf %87, %0 : vector<1x16x128xf32>
    %89 = arith.addf %71, %0 : vector<1x16x128xf32>
    %90 = arith.addf %89, %88 : vector<1x16x128xf32>
    %cst_29 = arith.constant 0.000000e+00 : f32
    %91 = vector.broadcast %cst_29 : f32 to vector<1x16x128xf32>
    %92 = arith.maximumf %90, %91 : vector<1x16x128xf32>
    %c0_30 = arith.constant 0 : index
    %c0_31 = arith.constant 0 : index
    %c0_32 = arith.constant 0 : index
    %93 = vector.load %arg6[%c0_30, %c0_31, %c0_32] : memref<1x16x128xf32, #tpu.memory_space<vmem>>, vector<1x16x128xf32>
    tpu.vector_store %arg6[%c0_30, %c0_31, %c0_32], %92 {strides = array<i32>} : memref<1x16x128xf32, #tpu.memory_space<vmem>>, vector<1x16x128xf32>,
    return
  }
  func.func @transform_0(%arg0: i32) -> (i32, i32, i32) {
    %c0_i32 = arith.constant 0 : i32
    %c0_i32_0 = arith.constant 0 : i32
    %c0_i32_1 = arith.constant 0 : i32
    return %arg0, %c0_i32, %c0_i32_0 : i32, i32, i32
  }
  func.func @transform_1(%arg0: i32) -> (i32, i32) {
    %c0_i32 = arith.constant 0 : i32
    %c0_i32_0 = arith.constant 0 : i32
    %c0_i32_1 = arith.constant 0 : i32
    return %c0_i32, %c0_i32_0 : i32, i32
  }
  func.func @transform_2(%arg0: i32) -> (i32, i32) {
    %c0_i32 = arith.constant 0 : i32
    %c0_i32_0 = arith.constant 0 : i32
    %c0_i32_1 = arith.constant 0 : i32
    return %c0_i32, %c0_i32_0 : i32, i32
  }
  func.func @transform_3(%arg0: i32) -> (i32, i32) {
    %c0_i32 = arith.constant 0 : i32
    %c0_i32_0 = arith.constant 0 : i32
    %c0_i32_1 = arith.constant 0 : i32
    return %c0_i32, %c0_i32_0 : i32, i32
  }
  func.func @transform_4(%arg0: i32) -> (i32, i32) {
    %c0_i32 = arith.constant 0 : i32
    %c0_i32_0 = arith.constant 0 : i32
    %c0_i32_1 = arith.constant 0 : i32
    return %c0_i32, %c0_i32_0 : i32, i32
  }
  func.func @transform_5(%arg0: i32) -> (i32, i32, i32) {
    %c0_i32 = arith.constant 0 : i32
    %c0_i32_0 = arith.constant 0 : i32
    %c0_i32_1 = arith.constant 0 : i32
    return %arg0, %c0_i32, %c0_i32_0 : i32, i32, i32
  }
}

</mosaic_0001>

<bundles_post_ra>
// kernel: tpu_custom_call.1
= control target key start
LH: loop header
LB: loop body
LE: loop exit
PB: predicated region body
PF: predicated region fallthrough
CT: control target
= control target key end

     0   :  { %10 = vsyncpa [#allocation3], 0  ;;  %s1659_s0 = inlined_call_operand.hbm [shape: f32[2,16,128], index: 0, kind: input, shape index: {}]   ;;  %s1660_s1 = inlined_call_operand.hbm [shape: f32[128,384], index: 1, kind: input, shape index: {}]   ;;  %s1661_s2 = inlined_call_operand.hbm [shape: f32[384,128], index: 2, kind: input, shape index: {}]   ;;  %s1662_s3 = inlined_call_operand.hbm [shape: f32[384,128], index: 3, kind: input, shape index: {}]   ;;  %s1663_s4 = inlined_call_operand.hbm [shape: f32[3,384], index: 4, kind: input, shape index: {}]   ;;  %s1664_s5 = inlined_call_operand.hbm [shape: f32[2,16,128], index: 5, kind: output, shape index: {}]  }
   0x1   :  { %12 = vsyncpa [#allocation3 + $0x1], 0 }
   0x2   :  { %13 = vsyncpa [#allocation6], 0 }
   0x3   :  { %14 = vsyncpa [#allocation9], 0 }
   0x4   :  { %15 = vsyncpa [#allocation4], 0 }
   0x5   :  { %17 = vsyncpa [#allocation4 + $0x1], 0  ;;  %s1421_s18 = smov 0   ;;  %s1423_s19 = smov 0  }
   0x6   :  { %s1425_s20 = smov 0   ;;  %s1427_s21 = smov 0  }
   0x7 LB: > { %s1442_s22 = sadd.s32 4294967295, %s1379_s21   ;;  %s1000_s23 = sadd.s32 4294967294, %s1379_s21   ;;  %s1379_s21 = sphi %s1427_s21, %s1681_s21   ;;  %s1375_s20 = sphi %s1425_s20, %s1680_s20   ;;  %s1371_s19 = sphi %s1423_s19, %s1679_s19   ;;  %s1367_s18 = sphi %s1421_s18, %s1678_s18  }
   0x8   : > { %p43_p0 = scmp.ne.s32.totalorder %s1371_s19, %s1367_s18  ;;  %p44_p1 = scmp.eq.s32.totalorder %s1442_s22, 0 }
   0x9   : > { %p151_p2 = scmp.eq.s32.totalorder %s1442_s22, 1  ;;  %p157_p3 = scmp.eq.s32.totalorder %s1000_s23, 1 }
   0xa   : > { %p1451_p4 = por %p44_p1, %p43_p0  ;;  %p1001_p5 = scmp.ge.s32.totalorder %s1379_s21, 1 }
   0xb   : > { %p1456_p6 = por %p157_p3, %p43_p0  ;;  %p164_p7 = scmp.lt.s32.totalorder %s1379_s21, 3 }
   0xc   : > { %s175_s28 = sshll.u32 %s1660_s1, 4  ;;  %s1381_s30 = smov [#allocation5]   ;;  %s176_s28 = int_to_ptr.hbm [resolvable:$true] %s175_s28 }
   0xd   : > { %p1464_p8 = pnand %p1001_p5, %p164_p7  ;;  %s177_s6 = sshll.u32 %s1381_s30, 4  ;;  %s178_s6 = int_to_ptr.vmem [resolvable:$true] %s177_s6 }
   0xe   : > { %s203_s10 = sshll.u32 %s1662_s3, 4  ;;  %s1382_s11 = smov 384   ;;  %s204_s10 = int_to_ptr.hbm [resolvable:$true] %s203_s10 }
   0xf   : > { %p1070_p9 = pneg %p1464_p8  ;;  %s1383_s12 = smov 24  }
  0x10   : > { %s1384_s13 = smov [#allocation8]   ;;  %s189_s17 = sshll.u32 %s1661_s2, 4  ;;  %s190_s17 = int_to_ptr.hbm [resolvable:$true] %s189_s17 }
  0x11   : > { %p1472_p10 = pnand %p1070_p9, %p44_p1  ;;  %s205_s14 = sshll.u32 %s1384_s13, 4  ;;  %s206_s14 = int_to_ptr.vmem [resolvable:$true] %s205_s14 }
  0x12   : > { %s1665_s23 = smov 128   ;;  %s1386_s26 = smov 8  }
  0x13   : > { %1073 = dma.hbm_to_vmem [thread:$0]  (!%p1472_p10), %s176_s28, 6144, %s178_s6, [#allocation6], %s1382_s11, %s1382_s11, %s1383_s12  }
  0x14   : > { %1079 = dma.hbm_to_vmem [thread:$0]  (!%p1472_p10), %s204_s10, 6144, %s206_s14, [#allocation9], %s1665_s23, %s1665_s23, %s1386_s26  }
  0x15   : > { %s218_s30 = sshll.u32 %s1663_s4, 4  ;;  %s1387_s6 = smov [#allocation7]   ;;  %s219_s30 = int_to_ptr.hbm [resolvable:$true] %s218_s30 }
  0x16   : > { %s191_s8 = sshll.u32 %s1387_s6, 4  ;;  %s1388_s9 = smov [#allocation10]   ;;  %s192_s8 = int_to_ptr.vmem [resolvable:$true] %s191_s8 }
  0x17   : > { %1076 = dma.hbm_to_vmem [thread:$0]  (!%p1472_p10), %s190_s17, 6144, %s192_s8, [#allocation6], %s1665_s23, %s1665_s23, %s1386_s26  }
  0x18   : > { %s220_s10 = sshll.u32 %s1388_s9, 4  ;;  %s1501_s11 = sadd.s32 1, %s1379_s21   ;;  %s221_s10 = int_to_ptr.vmem [resolvable:$true] %s220_s10 }
  0x19   : > { %1082 = dma.hbm_to_vmem [thread:$0]  (!%p1472_p10), %s219_s30, 192, %s221_s10, [#allocation9]  }
  0x1a   : > { %s30_s12 = sadd.s32 1, %s1375_s20  ;;  %s27_s13 = ssub.s32 %s1379_s21, %s1501_s11 }
  0x1b   : > { %p37_p12 = scmp.ne.s32.totalorder %s1375_s20, %s1371_s19  ;;  %p28_p13 = scmp.eq.s32.totalorder %s27_s13, 0 }
  0x1c   : > { %p38_p0 = scmp.eq.s32.totalorder %s1379_s21, 0  ;;  %p1095_p5 = scmp.lt.s32.totalorder %s1379_s21, 2 }
  0x1d   : > { %p1511_p3 = por %p151_p2, %p37_p12  ;;  %s231_s16 = sand.u32 1, %s1375_s20  }
  0x1e   : > { %s1517_s15 = scalar_select %p28_p13, %s1375_s20, %s30_s12  }
  0x1f   : > { %p39_p7 = por %p38_p0, %p37_p12  ;;  %s1007_s7 = sshll.u32 %s231_s16, 4 }
  0x20   : > { %s1032_s17 = sshll.u32 %s1379_s21, 4  ;;  %s235_s6 = scalar_lea.vmem [#allocation2], %s1007_s7 }
  0x21   : > { %s240_s30 = scalar_lea.hbm %s1659_s0, %s1032_s17  ;;  %s243_s8 = sshll.u32 %s235_s6, 4  ;;  %s244_s8 = int_to_ptr.vmem [resolvable:$true] %s243_s8 }
  0x22   : > { %s241_s9 = sshll.u32 %s240_s30, 4  ;;  %p1524_p2 = pnand %p1095_p5, %p39_p7  ;;  %s242_s9 = int_to_ptr.hbm [resolvable:$true] %s241_s9 }
  0x23   : > { %s232_s12 = scalar_lea.sflag [#allocation3], %s231_s16  ;;  %s1275_s13 = sshra.s32 %s242_s9, 4  ;;  %s1276_s13 = int_to_ptr.hbm [resolvable:$true] %s1275_s13 }
  0x24   : > { %s1277_s23 = scalar_lea.hbm %s1276_s13, 16  ;;  %p1279_p10 = pneg %p1524_p2 }
  0x25   : > { %p1278_p9 = scmp.ne.s32.totalorder %s1276_s13, %s1277_s23  ;;  %s1282_s27 = scalar_lea.hbm %s1659_s0, 32 }
  0x26   : > { %p1283_p0 = scmp.lt.s32.totalorder %s1276_s13, %s1659_s0  ;;  %p1284_p5 = scmp.lt.s32.totalorder %s1282_s27, %s1277_s23 }
  0x27   : > { %p1280_p12 = pnand %p1279_p10, %p1278_p9 }
  0x28   : > { %p1285_p7 = por %p1284_p5, %p1283_p0 }
  0x29   : > { %p1281_p13 = pneg %p1280_p12 }
  0x2b   : > { %p1286_p11 = pnand %p1285_p7, %p1281_p13 }
  0x2d   : > { %1289 = shalt.err (!%p1286_p11)
}
  0x2e   : > { %s1672_s16 = smov 128   ;;  %255 = sbr.rel (%p1464_p8) target bundleno = 869 (0x365), region = 40 }
  0x2f   : > { %1086 = dma.hbm_to_vmem [thread:$0]  (!%p1524_p2), %s242_s9, 256, %s244_s8, %s232_s12, %s1672_s16, %s1672_s16, %s1386_s26  }
  0x30   : > { %s1544_s6 = sand.u32 (!%p1464_p8), 1, %s1371_s19  }
  0x31   : > { %s1011_s23 = sshll.u32 (!%p1464_p8), %s1544_s6, 4  ;;  %s258_s13 = scalar_lea.sflag (!%p1464_p8), [#allocation3], %s1544_s6 }
  0x32   : > { %s1550_s17 = scalar_lea.vmem (!%p1464_p8), [#allocation2], %s1011_s23 }
  0x33   : > { %1350 = dma.done.wait (%p1451_p4), %s258_s13, 256  }
  0x34   : > { %1352 = vsyncadd (%p1451_p4), %s258_s13, 4294967040 }
  0x35   : > { %1354 = dma.done.wait (%p44_p1), [#allocation6], 12288  }
  0x36   : > { %1356 = vsyncadd (%p44_p1), [#allocation6], 4294955008 }
  0x37   : > { %1358 = dma.done.wait (%p44_p1), [#allocation9], 6336  }
  0x38   : > { %1360 = vsyncadd (%p44_p1), [#allocation9], 4294960960  ;;  %v359_v0 = vld [vmem:[#allocation5 + $0x170] sm:$0xff]  ;;  %v356_v1 = vld [vmem:[#allocation5 + $0x158] sm:$0xff]  ;;  %vm479_vm2 = vcmask 130048   ;;  %vm557_vm7 = vcmask 1041408  }
  0x39   : > { %395 = vmatpush.msra.mxu1 %v359_v0  ;;  %v353_v2 = vld [vmem:[#allocation5 + $0x140] sm:$0xff]  ;;  %v358_v3 = vld [vmem:[#allocation5 + $0x168] sm:$0xff]  ;;  %v355_v4 = vld [vmem:[#allocation5 + $0x150] sm:$0xff]  ;;  %vm564_vm8 = vcmask 1040384   ;;  %s1033_s24 = sshll.u32 %s1442_s22, 4  ;;  %s308_s29 = scalar_lea.vmem [#allocation11], %s1011_s23 }
  0x3a   : > { %372 = vmatpush.msra.mxu0 %v358_v3  ;;  %v350_v5 = vld [vmem:[#allocation5 + $0x128] sm:$0xff]  ;;  %v352_v6 = vld [vmem:[#allocation5 + $0x138] sm:$0xff]  ;;  %v347_v7 = vld [vmem:[#allocation5 + $0x110] sm:$0xff]  ;;  %s885_s9 = scalar_lea.hbm %s1664_s5, %s1033_s24  ;;  %s886_s10 = sshll.u32 %s308_s29, 4  ;;  %s887_s10 = int_to_ptr.vmem [resolvable:$true] %s886_s10 }
  0x3b   : > { %396 = vmatpush.msra.mxu1 %v356_v1  ;;  %v349_v8 = vld [vmem:[#allocation5 + $0x120] sm:$0xff]  ;;  %v344_v9 = vld [vmem:[#allocation5 + $0xf8] sm:$0xff]  ;;  %v346_v10 = vld [vmem:[#allocation5 + $0x108] sm:$0xff]  ;;  %v466_v1 = vlaneseq  ;;  %s888_s12 = sshll.u32 %s885_s9, 4  ;;  %s874_s22 = scalar_lea.sflag [#allocation4], %s1544_s6  ;;  %s889_s12 = int_to_ptr.hbm [resolvable:$true] %s888_s12 }
  0x3c   : > { %373 = vmatpush.msra.mxu0 %v355_v4  ;;  %v341_v11 = vld [vmem:[#allocation5 + $0xe0] sm:$0xff]  ;;  %v343_v12 = vld [vmem:[#allocation5 + $0xf0] sm:$0xff]  ;;  %v338_v13 = vld [vmem:[#allocation5 + $0xc8] sm:$0xff]  ;;  %s1319_s7 = sshra.s32 %s889_s12, 4  ;;  %s1325_s16 = scalar_lea.hbm %s1664_s5, 32  ;;  %s1320_s7 = int_to_ptr.hbm [resolvable:$true] %s1319_s7 }
  0x3d   : > { %397 = vmatpush.msra.mxu1 %v353_v2  ;;  %v340_v14 = vld [vmem:[#allocation5 + $0xd8] sm:$0xff]  ;;  %v335_v15 = vld [vmem:[#allocation5 + $0xb0] sm:$0xff]  ;;  %v337_v16 = vld [vmem:[#allocation5 + $0xc0] sm:$0xff]  ;;  %v467_v3 = vshrl.u32 %v466_v1, 7  ;;  %v470_v4 = vand.u32 127, %v466_v1  ;;  %s1321_s27 = scalar_lea.hbm %s1320_s7, 16  ;;  %p1326_p11 = scmp.lt.s32.totalorder %s1320_s7, %s1664_s5 }
  0x3e   : > { %374 = vmatpush.msra.mxu0 %v352_v6  ;;  %v332_v17 = vld [vmem:[#allocation5 + $0x98] sm:$0xff]  ;;  %v334_v18 = vld [vmem:[#allocation5 + $0xa8] sm:$0xff]  ;;  %v329_v19 = vld [vmem:[#allocation5 + $0x80] sm:$0xff]  ;;  %p1322_p1 = scmp.ne.s32.totalorder %s1320_s7, %s1321_s27  ;;  %p1327_p2 = scmp.lt.s32.totalorder %s1325_s16, %s1321_s27 }
  0x3f   : > { %398 = vmatpush.msra.mxu1 %v350_v5  ;;  %v331_v20 = vld [vmem:[#allocation5 + $0x90] sm:$0xff]  ;;  %v326_v21 = vld [vmem:[#allocation5 + $0x68] sm:$0xff]  ;;  %v328_v22 = vld [vmem:[#allocation5 + $0x78] sm:$0xff]  ;;  %v468_v5 = vadd.s32 8, %v467_v3  ;;  %vm471_vm0 = vcmp.le.s32.totalorder %v470_v4, %v467_v3 }
  0x40   : > { %375 = vmatpush.msra.mxu0 %v349_v8  ;;  %v323_v23 = vld [vmem:[#allocation5 + $0x50] sm:$0xff]  ;;  %v325_v24 = vld [vmem:[#allocation5 + $0x60] sm:$0xff]  ;;  %v320_v25 = vld [vmem:[#allocation5 + $0x38] sm:$0xff]  ;;  %p1323_p4 = pnand %p1322_p1, %p1511_p3  ;;  %p1328_p9 = por %p1327_p2, %p1326_p11 }
  0x41   : > { %399 = vmatpush.msra.mxu1 %v347_v7  ;;  %v322_v26 = vld [vmem:[#allocation5 + $0x48] sm:$0xff]  ;;  %v317_v27 = vld [vmem:[#allocation5 + $0x20] sm:$0xff]  ;;  %v319_v28 = vld [vmem:[#allocation5 + $0x30] sm:$0xff]  ;;  %vm472_vm1 = vcmp.le.s32.totalorder %v470_v4, %v468_v5 }
  0x42   : > { %376 = vmatpush.msra.mxu0 %v346_v10  ;;  %v314_v29 = vld [vmem:[#allocation5 + $0x8] sm:$0xff]  ;;  %v316_v30 = vld [vmem:[#allocation5 + $0x18] sm:$0xff]  ;;  %v1565_v31 = vld [vmem:[%s1550_s17] sm:$0xff]  ;;  %p1324_p8 = pneg %p1323_p4 }
  0x43   : > { %400 = vmatpush.msra.mxu1 %v344_v9  ;;  %v313_v32 = vld [vmem:[#allocation5] sm:$0xff]  ;;  %v1570_v33 = vld [vmem:[%s1550_s17 + $0x8] sm:$0xff]  ;;  %v351_v37 = vld [vmem:[#allocation5 + $0x130] sm:$0xff] }
  0x44   : > { %377 = vmatpush.msra.mxu0 %v343_v12  ;;  %v360_v34 = vld [vmem:[#allocation5 + $0x178] sm:$0xff]  ;;  %v357_v35 = vld [vmem:[#allocation5 + $0x160] sm:$0xff]  ;;  %v354_v36 = vld [vmem:[#allocation5 + $0x148] sm:$0xff]  ;;  %p1329_p10 = pnand %p1328_p9, %p1324_p8 }
  0x45   : > { %401 = vmatpush.msra.mxu1 %v341_v11  ;;  %418 = vmatpush.msra.mxu2 %v360_v34  ;;  %v348_v38 = vld [vmem:[#allocation5 + $0x118] sm:$0xff]  ;;  %v345_v39 = vld [vmem:[#allocation5 + $0x100] sm:$0xff]  ;;  %v342_v40 = vld [vmem:[#allocation5 + $0xe8] sm:$0xff] }
  0x46   : > { %378 = vmatpush.msra.mxu0 %v340_v14  ;;  %v339_v41 = vld [vmem:[#allocation5 + $0xd0] sm:$0xff]  ;;  %v1574_v42 = vld [vmem:[#allocation10] sm:$0x77]  ;;  %v336_v44 = vld [vmem:[#allocation5 + $0xb8] sm:$0xff] }
  0x47   : > { %402 = vmatpush.msra.mxu1 %v338_v13  ;;  %419 = vmatpush.msra.mxu2 %v357_v35  ;;  %v363_v45 = vperm.slane %v1574_v42, 0  ;;  %v333_v46 = vld [vmem:[#allocation5 + $0xa0] sm:$0xff]  ;;  %v364_v47 = vperm.slane %v1574_v42, 4  ;;  %v330_v48 = vld [vmem:[#allocation5 + $0x88] sm:$0xff]  ;;  %v327_v51 = vld [vmem:[#allocation5 + $0x70] sm:$0xff] }
  0x48   : > { %379 = vmatpush.msra.mxu0 %v337_v16  ;;  %v324_v54 = vld [vmem:[#allocation5 + $0x58] sm:$0xff]  ;;  %v321_v57 = vld [vmem:[#allocation5 + $0x40] sm:$0xff]  ;;  %v318_v58 = vld [vmem:[#allocation5 + $0x28] sm:$0xff] }
  0x49   : > { %403 = vmatpush.msra.mxu1 %v335_v15  ;;  %420 = vmatpush.msra.mxu2 %v354_v36  ;;  %v369_v50 = vperm.slane %v363_v45, 0  ;;  %v370_v52 = vperm.slane %v364_v47, 0  ;;  %v315_v61 = vld [vmem:[#allocation5 + $0x10] sm:$0xff]  ;;  %v596_v1 = vld [vmem:[#allocation7 + $0xc8] sm:$0xff]  ;;  %vm1597_vm9 = vmneg %vm557_vm7 }
  0x4a   : > { %380 = vmatpush.msra.mxu0 %v334_v18  ;;  %v617_v45 = vld [vmem:[#allocation7 + $0x170] sm:$0xff]  ;;  %vm1602_vm10 = vmneg %vm564_vm8 }
  0x4b   : > { %404 = vmatpush.msra.mxu1 %v332_v17  ;;  %421 = vmatpush.msra.mxu2 %v351_v37  ;;  %v312_v17 = vld [vmem:[#allocation10 + $0x8] sm:$0x7]  ;;  %v601_v47 = vld [vmem:[#allocation7 + $0xf0] sm:$0xff] }
  0x4c   : > { %381 = vmatpush.msra.mxu0 %v331_v20  ;;  %v365_v18 = vperm.slane %v312_v17, 0  ;;  %v610_v17 = vld [vmem:[#allocation7 + $0x138] sm:$0xff] }
  0x4d   : > { %405 = vmatpush.msra.mxu1 %v329_v19  ;;  %422 = vmatpush.msra.mxu2 %v348_v38 }
  0x4e   : > { %382 = vmatpush.msra.mxu0 %v328_v22  ;;  %v371_v20 = vperm.slane %v365_v18, 0  ;;  %v578_v18 = vld [vmem:[#allocation7 + $0x38] sm:$0xff] }
  0x4f   : > { %406 = vmatpush.msra.mxu1 %v326_v21  ;;  %423 = vmatpush.msra.mxu2 %v345_v39 }
  0x50   : > { %383 = vmatpush.msra.mxu0 %v325_v24 }
  0x51   : > { %407 = vmatpush.msra.mxu1 %v323_v23  ;;  %424 = vmatpush.msra.mxu2 %v342_v40 }
  0x52   : > { %384 = vmatpush.msra.mxu0 %v322_v26 }
  0x53   : > { %408 = vmatpush.msra.mxu1 %v320_v25  ;;  %425 = vmatpush.msra.mxu2 %v339_v41  ;;  %v618_v41 = vld [vmem:[#allocation7 + $0x178] sm:$0xff] }
  0x54   : > { %385 = vmatpush.msra.mxu0 %v319_v28 }
  0x55   : > { %409 = vmatpush.msra.mxu1 %v317_v27  ;;  %426 = vmatpush.msra.mxu2 %v336_v44  ;;  %v602_v44 = vld [vmem:[#allocation7 + $0xf8] sm:$0xff] }
  0x56   : > { %386 = vmatpush.msra.mxu0 %v316_v30 }
  0x57   : > { %410 = vmatpush.msra.mxu1 %v314_v29  ;;  %427 = vmatpush.msra.mxu2 %v333_v46  ;;  %v585_v46 = vld [vmem:[#allocation7 + $0x70] sm:$0xff] }
  0x58   : > { %411 = vmatmul.f32.vlgmr.msra.gmra.mxu1 %v1565_v31  ;;  %387 = vmatpush.msra.mxu0 %v313_v32 }
  0x59   : > { %388 = vmatmul.f32.vlgmr.msra.gmra.mxu0 %v1565_v31  ;;  %428 = vmatpush.msra.mxu2 %v330_v48 }
  0x5a   : > { %666 = vmatpush.msrb.mxu1 %v618_v41  ;;  %643 = vmatpush.msrb.mxu0 %v602_v44  ;;  %v571_v41 = vld [vmem:[#allocation7] sm:$0xff] }
  0x5b   : > { %429 = vmatpush.msra.mxu2 %v327_v51  ;;  %v600_v51 = vld [vmem:[#allocation7 + $0xe8] sm:$0xff] }
  0x5c   : > { %667 = vmatpush.msrb.mxu1 %v617_v45  ;;  %644 = vmatpush.msrb.mxu0 %v601_v47 }
  0x5d   : > { %430 = vmatpush.msra.mxu2 %v324_v54  ;;  %v599_v54 = vld [vmem:[#allocation7 + $0xe0] sm:$0xff] }
  0x5e   : > { %645 = vmatpush.msrb.mxu0 %v600_v51 }
  0x5f   : > { %431 = vmatpush.msra.mxu2 %v321_v57  ;;  %v598_v57 = vld [vmem:[#allocation7 + $0xd8] sm:$0xff] }
  0x60   : > { %414 = vmatmul.f32.gmra.mxu1 %v1570_v33  ;;  %646 = vmatpush.msrb.mxu0 %v599_v54  ;;  %v752_v54 = vld [vmem:[#allocation8 + $0x178] sm:$0xff] }
  0x61   : > { %391 = vmatmul.f32.gmra.mxu0 %v1570_v33  ;;  %432 = vmatpush.msra.mxu2 %v318_v58  ;;  %v613_v58 = vld [vmem:[#allocation7 + $0x150] sm:$0xff] }
  0x62   : > { %647 = vmatpush.msrb.mxu0 %v598_v57  ;;  %v751_v57 = vld [vmem:[#allocation8 + $0x170] sm:$0xff] }
  0x63   : > { %433 = vmatpush.msra.mxu2 %v315_v61 }
  0x64   : > { %434 = vmatmul.f32.vlgmr.msra.gmra.mxu2 %v1565_v31 }
  0x6c   : > { %437 = vmatmul.f32.gmra.mxu2 %v1570_v33 }
  0xd5   : > { %v412_v43 = vpop.f32.mrf.mxu1 }
  0xd6   : > { %v389_v49 = vpop.f32.mrf.mxu0  ;;  %v413_v59 = vadd.f32 %v412_v43, %v370_v52  ;;  %v586_v43 = vld [vmem:[#allocation7 + $0x78] sm:$0xff] }
  0xd7   : > { %v390_v56 = vadd.f32 %v389_v49, %v369_v50  ;;  %v616_v49 = vld [vmem:[#allocation7 + $0x168] sm:$0xff] }
  0xd8   : > { %668 = vmatpush.msrb.mxu1 %v616_v49 }
  0xd9   : > { %v441_v60 = vmul.f32 0.5, %v390_v56  ;;  %v582_v56 = vld [vmem:[#allocation7 + $0x58] sm:$0xff] }
  0xdd   : > { %v415_v53 = vpop.f32.mrf.mxu1 }
  0xde   : > { %v416_v55 = vadd.f32 %v415_v53, %v370_v52  ;;  %v392_v62 = vpop.f32.mrf.mxu0  ;;  %v615_v52 = vld [vmem:[#allocation7 + $0x160] sm:$0xff] }
  0xdf   : > { %v393_v63 = vadd.f32 %v392_v62, %v369_v50  ;;  %v584_v50 = vld [vmem:[#allocation7 + $0x68] sm:$0xff]  ;;  %v583_v53 = vld [vmem:[#allocation7 + $0x60] sm:$0xff]  ;;  %669 = vmatpush.msrb.mxu1 %v615_v52 }
  0xe0   : > { %457 = vmatpush.xpose.msra.mxu3 %v416_v55  ;;  %v614_v55 = vld [vmem:[#allocation7 + $0x158] sm:$0xff]  ;;  %v612_v62 = vld [vmem:[#allocation7 + $0x148] sm:$0xff] }
  0xe1   : > { %v442_v0 = vmul.f32 0.5, %v393_v63  ;;  %670 = vmatpush.msrb.mxu1 %v614_v55  ;;  %v580_v63 = vld [vmem:[#allocation7 + $0x48] sm:$0xff]  ;;  %v720_v55 = vld [vmem:[#allocation8 + $0x78] sm:$0xff] }
  0xe2   : > { %754 = vmatpush.msrb.mxu2 %v720_v55 }
  0xe3   : > { %671 = vmatpush.msrb.mxu1 %v613_v58  ;;  %v719_v58 = vld [vmem:[#allocation8 + $0x70] sm:$0xff] }
  0xe4   : > { %458 = vmatpush.xpose.msra.mxu3 %v413_v59  ;;  %v581_v59 = vld [vmem:[#allocation7 + $0x50] sm:$0xff]  ;;  %755 = vmatpush.msrb.mxu2 %v719_v58 }
  0xe5   : > { %672 = vmatpush.msrb.mxu1 %v612_v62  ;;  %v734_v62 = vld [vmem:[#allocation8 + $0xe8] sm:$0xff] }
  0xe7   : > { %459 = vmatmul.f32.vlgmr.msra.gmra.mxu3 %v441_v60  ;;  %v435_v14 = vpop.f32.mrf.mxu2  ;;  %v597_v60 = vld [vmem:[#allocation7 + $0xd0] sm:$0xff] }
  0xe8   : > { %v436_v23 = vadd.f32 %v435_v14, %v371_v20  ;;  %648 = vmatpush.msrb.mxu0 %v597_v60  ;;  %v750_v60 = vld [vmem:[#allocation8 + $0x168] sm:$0xff] }
  0xea   : > { %649 = vmatpush.msrb.mxu0 %v596_v1  ;;  %v733_v1 = vld [vmem:[#allocation8 + $0xe0] sm:$0xff] }
  0xef   : > { %462 = vmatmul.f32.gmra.mxu3 %v442_v0  ;;  %v438_v22 = vpop.f32.mrf.mxu2 }
  0xf0   : > { %v439_v24 = vadd.f32 %v438_v22, %v371_v20  ;;  %v609_v20 = vld [vmem:[#allocation7 + $0x130] sm:$0xff] }
  0xf1   : > { %v593_v22 = vld [vmem:[#allocation7 + $0xb0] sm:$0xff] }
  0xf2   : > { %540 = vmatpush.msrb.mxu3 %v439_v24  ;;  %v576_v24 = vld [vmem:[#allocation7 + $0x28] sm:$0xff] }
  0xf4   : > { %541 = vmatpush.msrb.mxu3 %v436_v23  ;;  %v608_v23 = vld [vmem:[#allocation7 + $0x128] sm:$0xff] }
  0xf6   : > { %620 = vmatpush.msra.mxu3 %v586_v43  ;;  %v587_v43 = vld [vmem:[#allocation7 + $0x80] sm:$0xff] }
  0xf8   : > { %621 = vmatpush.msra.mxu3 %v585_v46 }
  0xfa   : > { %622 = vmatpush.msra.mxu3 %v584_v50 }
  0xfc   : > { %623 = vmatpush.msra.mxu3 %v583_v53 }
  0xfe   : > { %624 = vmatpush.msra.mxu3 %v582_v56  ;;  %v736_v56 = vld [vmem:[#allocation8 + $0xf8] sm:$0xff] }
 0x100   : > { %625 = vmatpush.msra.mxu3 %v581_v59  ;;  %v735_v59 = vld [vmem:[#allocation8 + $0xf0] sm:$0xff] }
 0x102   : > { %626 = vmatpush.msra.mxu3 %v580_v63  ;;  %v749_v63 = vld [vmem:[#allocation8 + $0x160] sm:$0xff] }
 0x16a   : > { %v460_v2 = vpop.f32.mrf.mxu3 }
 0x16b   : > { %v477_v6 = vsel %vm471_vm0, %v460_v2, -1e+30  ;;  %v611_v2 = vld [vmem:[#allocation7 + $0x140] sm:$0xff] }
 0x16c   : > { %v480_v9 = vsel %vm479_vm2, %v477_v6, -inf  ;;  %673 = vmatpush.msrb.mxu1 %v611_v2  ;;  %v748_v2 = vld [vmem:[#allocation8 + $0x158] sm:$0xff] }
 0x16e   : > { %674 = vmatpush.msrb.mxu1 %v610_v17  ;;  %v743_v17 = vld [vmem:[#allocation8 + $0x130] sm:$0xff] }
 0x170   : > { %675 = vmatpush.msrb.mxu1 %v609_v20  ;;  %v742_v20 = vld [vmem:[#allocation8 + $0x128] sm:$0xff] }
 0x172   : > { %v463_v7 = vpop.f32.mrf.mxu3  ;;  %676 = vmatpush.msrb.mxu1 %v608_v23  ;;  %v741_v23 = vld [vmem:[#allocation8 + $0x120] sm:$0xff] }
 0x173   : > { %v478_v8 = vsel %vm472_vm1, %v463_v7, -1e+30 }
 0x174   : > { %v481_v10 = vsel %vm479_vm2, %v478_v8, -inf }
 0x175   : > { %v482_v11 = vmax.f32 %v480_v9, %v481_v10 }
 0x177   : > { %v483_v12 = vrot.slane %v482_v11, 4 }
 0x179   : > { %v484_v13 = vmax.f32 %v482_v11, %v483_v12 }
 0x17b   : > { %v485_v15 = vrot.slane %v484_v13, 2 }
 0x17d   : > { %v486_v16 = vmax.f32 %v484_v13, %v485_v15  ;;  %v579_v15 = vld [vmem:[#allocation7 + $0x40] sm:$0xff] }
 0x17e   : > { %627 = vmatpush.msra.mxu3 %v579_v15  ;;  %v712_v15 = vld [vmem:[#allocation8 + $0x38] sm:$0xff] }
 0x17f   : > { %v487_v19 = vrot.slane %v486_v16, 1 }
 0x180   : > { %628 = vmatpush.msra.mxu3 %v578_v18  ;;  %v711_v18 = vld [vmem:[#allocation8 + $0x30] sm:$0xff] }
 0x181   : > { %v488_v21 = vmax.f32 %v486_v16, %v487_v19  ;;  %v595_v16 = vld [vmem:[#allocation7 + $0xc0] sm:$0xff]  ;;  %v594_v19 = vld [vmem:[#allocation7 + $0xb8] sm:$0xff] }
 0x182   : > { %650 = vmatpush.msrb.mxu0 %v595_v16  ;;  %v728_v16 = vld [vmem:[#allocation8 + $0xb8] sm:$0xff] }
 0x183   : > { %v489_v25 = vsub.f32 %v477_v6, %v488_v21  ;;  %v490_v26 = vsub.f32 %v478_v8, %v488_v21  ;;  %v577_v21 = vld [vmem:[#allocation7 + $0x30] sm:$0xff] }
 0x184   : > { %651 = vmatpush.msrb.mxu0 %v594_v19  ;;  %629 = vmatpush.msra.mxu3 %v577_v21  ;;  %v727_v19 = vld [vmem:[#allocation8 + $0xb0] sm:$0xff]  ;;  %v710_v21 = vld [vmem:[#allocation8 + $0x28] sm:$0xff] }
 0x185   : > { %v491_v27 = vmul.f32 1.442695, %v489_v25  ;;  %v493_v28 = vmul.f32 1.442695, %v490_v26  ;;  %v592_v25 = vld [vmem:[#allocation7 + $0xa8] sm:$0xff]  ;;  %v607_v26 = vld [vmem:[#allocation7 + $0x120] sm:$0xff] }
 0x186   : > { %652 = vmatpush.msrb.mxu0 %v593_v22  ;;  %630 = vmatpush.msra.mxu3 %v576_v24  ;;  %v726_v22 = vld [vmem:[#allocation8 + $0xa8] sm:$0xff]  ;;  %v709_v24 = vld [vmem:[#allocation8 + $0x20] sm:$0xff] }
 0x187   : > { %1143 = vpow2.f32 %v491_v27  ;;  %677 = vmatpush.msrb.mxu1 %v607_v26  ;;  %v575_v27 = vld [vmem:[#allocation7 + $0x20] sm:$0xff]  ;;  %v740_v26 = vld [vmem:[#allocation8 + $0x118] sm:$0xff] }
 0x188   : > { %1145 = vpow2.f32 %v493_v28  ;;  %653 = vmatpush.msrb.mxu0 %v592_v25  ;;  %v591_v28 = vld [vmem:[#allocation7 + $0xa0] sm:$0xff]  ;;  %631 = vmatpush.msra.mxu3 %v575_v27  ;;  %v708_v27 = vld [vmem:[#allocation8 + $0x18] sm:$0xff] }
 0x189   : > { %v725_v25 = vld [vmem:[#allocation8 + $0xa0] sm:$0xff] }
 0x18a   : > { %654 = vmatpush.msrb.mxu0 %v591_v28  ;;  %v724_v28 = vld [vmem:[#allocation8 + $0x98] sm:$0xff] }
 0x18d   : > { %v1582_v29 = vpop.eup %1143 }
 0x18e   : > { %v1584_v30 = vpop.eup %1145  ;;  %v495_v32 = vsel %vm479_vm2, %v1582_v29, 0.0 }
 0x18f   : > { %v496_v34 = vsel %vm479_vm2, %v1584_v30, 0.0 }
 0x190   : > { %v497_v35 = vadd.f32 %v496_v34, %v495_v32  ;;  %v590_v32 = vld [vmem:[#allocation7 + $0x98] sm:$0xff]  ;;  %v605_v34 = vld [vmem:[#allocation7 + $0x110] sm:$0xff] }
 0x191   : > { %655 = vmatpush.msrb.mxu0 %v590_v32  ;;  %v723_v32 = vld [vmem:[#allocation8 + $0x90] sm:$0xff] }
 0x192   : > { %v498_v36 = vrot.slane %v497_v35, 4 }
 0x194   : > { %v499_v37 = vadd.f32 %v498_v36, %v497_v35  ;;  %v573_v35 = vld [vmem:[#allocation7 + $0x10] sm:$0xff] }
 0x195   : > { %v589_v36 = vld [vmem:[#allocation7 + $0x90] sm:$0xff] }
 0x196   : > { %v500_v38 = vrot.slane %v499_v37, 2  ;;  %656 = vmatpush.msrb.mxu0 %v589_v36  ;;  %v722_v36 = vld [vmem:[#allocation8 + $0x88] sm:$0xff] }
 0x198   : > { %v501_v39 = vadd.f32 %v500_v38, %v499_v37  ;;  %v604_v37 = vld [vmem:[#allocation7 + $0x108] sm:$0xff] }
 0x199   : > { %v572_v38 = vld [vmem:[#allocation7 + $0x8] sm:$0xff] }
 0x19a   : > { %v502_v40 = vrot.slane %v501_v39, 1 }
 0x19c   : > { %v503_v48 = vadd.f32 %v502_v40, %v501_v39  ;;  %v588_v39 = vld [vmem:[#allocation7 + $0x88] sm:$0xff]  ;;  %v603_v40 = vld [vmem:[#allocation7 + $0x100] sm:$0xff] }
 0x19d   : > { %657 = vmatpush.msrb.mxu0 %v588_v39  ;;  %v721_v39 = vld [vmem:[#allocation8 + $0x80] sm:$0xff] }
 0x19e   : > { %1147 = vrcp.f32 %v503_v48  ;;  %v515_v4 = vand.u32 2147483648, %v503_v48  ;;  %v513_v6 = vand.u32 2147483647, %v503_v48  ;;  %vm509_vm4 = vweird.f32 %v503_v48 }
 0x19f   : > { %658 = vmatpush.msrb.mxu0 %v587_v43 }
 0x1a0   : > { %v516_v8 = vor.u32 1.1754944e-38, %v515_v4  ;;  %vm514_vm6 = vcmp.eq.f32.partialorder %v513_v6, 8.507059e+37  ;;  %v732_v4 = vld [vmem:[#allocation8 + $0xd8] sm:$0xff]  ;;  %v715_v6 = vld [vmem:[#allocation8 + $0x50] sm:$0xff] }
 0x1a1   : > { %800 = vmatpush.msra.mxu0 %v752_v54 }
 0x1a3   : > { %801 = vmatpush.msra.mxu0 %v751_v57 }
 0x1a4   : > { %v1148_v61 = vpop.eup %1147 }
 0x1a5   : > { %v505_v0 = vmul.f32 %v1148_v61, %v503_v48  ;;  %vm510_vm3 = vweird.f32 %v1148_v61  ;;  %802 = vmatpush.msra.mxu0 %v750_v60 }
 0x1a6   : > { %vm511_vm5 = vmor %vm509_vm4, %vm510_vm3 }
 0x1a7   : > { %v506_v3 = vsub.f32 1.0, %v505_v0  ;;  %v717_v0 = vld [vmem:[#allocation8 + $0x60] sm:$0xff]  ;;  %803 = vmatpush.msra.mxu0 %v749_v63 }
 0x1a9   : > { %v507_v5 = vmul.f32 %v1148_v61, %v506_v3  ;;  %v716_v3 = vld [vmem:[#allocation8 + $0x58] sm:$0xff]  ;;  %804 = vmatpush.msra.mxu0 %v748_v2 }
 0x1ab   : > { %v508_v7 = vadd.f32 %v1148_v61, %v507_v5  ;;  %v747_v5 = vld [vmem:[#allocation8 + $0x150] sm:$0xff] }
 0x1ac   : > { %805 = vmatpush.msra.mxu0 %v747_v5 }
 0x1ad   : > { %v512_v9 = vsel %vm511_vm5, %v1148_v61, %v508_v7  ;;  %v718_v61 = vld [vmem:[#allocation8 + $0x68] sm:$0xff]  ;;  %v731_v7 = vld [vmem:[#allocation8 + $0xd0] sm:$0xff] }
 0x1ae   : > { %v517_v10 = vsel %vm514_vm6, %v516_v8, %v512_v9  ;;  %756 = vmatpush.msrb.mxu2 %v718_v61  ;;  %v746_v8 = vld [vmem:[#allocation8 + $0x148] sm:$0xff] }
 0x1af   : > { %v518_v11 = vmul.f32 %v1582_v29, %v517_v10  ;;  %v519_v13 = vmul.f32 %v1584_v30, %v517_v10  ;;  %v606_v29 = vld [vmem:[#allocation7 + $0x118] sm:$0xff]  ;;  %806 = vmatpush.msra.mxu0 %v746_v8  ;;  %v714_v9 = vld [vmem:[#allocation8 + $0x48] sm:$0xff] }
 0x1b0   : > { %678 = vmatpush.msrb.mxu1 %v606_v29  ;;  %v574_v30 = vld [vmem:[#allocation7 + $0x18] sm:$0xff]  ;;  %757 = vmatpush.msrb.mxu2 %v717_v0  ;;  %v730_v10 = vld [vmem:[#allocation8 + $0xc8] sm:$0xff]  ;;  %v739_v29 = vld [vmem:[#allocation8 + $0x110] sm:$0xff] }
 0x1b1   : > { %1017 = vmatmul.msk.f32.vlgmr.msrb.gmra.mxu3 %vm479_vm2, %v518_v11  ;;  %v549_v12 = vsel %vm479_vm2, %v518_v11, 0.0  ;;  %v552_v14 = vsel %vm479_vm2, %v519_v13, 0.0  ;;  %v745_v11 = vld [vmem:[#allocation8 + $0x140] sm:$0xff] }
 0x1b2   : > { %550 = vadd.xlane.f32.xlu0 %v549_v12  ;;  %632 = vmatpush.msra.mxu3 %v574_v30  ;;  %v713_v12 = vld [vmem:[#allocation8 + $0x40] sm:$0xff]  ;;  %v707_v30 = vld [vmem:[#allocation8 + $0x10] sm:$0xff] }
 0x1b3   : > { %679 = vmatpush.msrb.mxu1 %v605_v34  ;;  %758 = vmatpush.msrb.mxu2 %v716_v3  ;;  %v738_v34 = vld [vmem:[#allocation8 + $0x108] sm:$0xff] }
 0x1b4   : > { %633 = vmatpush.msra.mxu3 %v573_v35  ;;  %807 = vmatpush.msra.mxu0 %v745_v11  ;;  %v706_v35 = vld [vmem:[#allocation8 + $0x8] sm:$0xff] }
 0x1b5   : > { %680 = vmatpush.msrb.mxu1 %v604_v37  ;;  %759 = vmatpush.msrb.mxu2 %v715_v6  ;;  %v737_v37 = vld [vmem:[#allocation8 + $0x100] sm:$0xff] }
 0x1b6   : > { %634 = vmatpush.msra.mxu3 %v572_v38  ;;  %v705_v38 = vld [vmem:[#allocation8] sm:$0xff] }
 0x1b7   : > { %681 = vmatpush.msrb.mxu1 %v603_v40  ;;  %760 = vmatpush.msrb.mxu2 %v714_v9  ;;  %v619_v40 = vperm.slane %v1574_v42, 1 }
 0x1b8   : > { %635 = vmatpush.msra.mxu3 %v571_v41 }
 0x1b9   : > { %1018 = vmatmul.msk.f32.gmra.mxu3 %vm479_vm2, %v519_v13  ;;  %1034 = vmatpush.msra.mxu1 %v752_v54  ;;  %v729_v13 = vld [vmem:[#allocation8 + $0xc0] sm:$0xff] }
 0x1ba   : > { %553 = vadd.xlane.f32.xlu0 %v552_v14  ;;  %777 = vmatpush.msrb.mxu3 %v736_v56  ;;  %v744_v14 = vld [vmem:[#allocation8 + $0x138] sm:$0xff] }
 0x1bb   : > { %1035 = vmatpush.msra.mxu1 %v751_v57  ;;  %761 = vmatpush.msrb.mxu2 %v713_v12 }
 0x1bc   : > { %778 = vmatpush.msrb.mxu3 %v735_v59  ;;  %808 = vmatpush.msra.mxu0 %v744_v14 }
 0x1bd   : > { %1036 = vmatpush.msra.mxu1 %v750_v60  ;;  %762 = vmatpush.msrb.mxu2 %v712_v15 }
 0x1be   : > { %779 = vmatpush.msrb.mxu3 %v734_v62  ;;  %809 = vmatpush.msra.mxu0 %v743_v17 }
 0x1bf   : > { %1037 = vmatpush.msra.mxu1 %v749_v63  ;;  %763 = vmatpush.msrb.mxu2 %v711_v18 }
 0x1c0   : > { %780 = vmatpush.msrb.mxu3 %v733_v1  ;;  %810 = vmatpush.msra.mxu0 %v742_v20 }
 0x1c1   : > { %1038 = vmatpush.msra.mxu1 %v748_v2  ;;  %764 = vmatpush.msrb.mxu2 %v710_v21 }
 0x1c2   : > { %781 = vmatpush.msrb.mxu3 %v732_v4  ;;  %811 = vmatpush.msra.mxu0 %v741_v23 }
 0x1c3   : > { %1039 = vmatpush.msra.mxu1 %v747_v5  ;;  %765 = vmatpush.msrb.mxu2 %v709_v24 }
 0x1c4   : > { %782 = vmatpush.msrb.mxu3 %v731_v7  ;;  %812 = vmatpush.msra.mxu0 %v740_v26 }
 0x1c5   : > { %1040 = vmatpush.msra.mxu1 %v746_v8  ;;  %766 = vmatpush.msrb.mxu2 %v708_v27  ;;  %v753_v27 = vperm.slane %v1574_v42, 2 }
 0x1c6   : > { %783 = vmatpush.msrb.mxu3 %v730_v10  ;;  %813 = vmatpush.msra.mxu0 %v739_v29 }
 0x1c7   : > { %1041 = vmatpush.msra.mxu1 %v745_v11  ;;  %767 = vmatpush.msrb.mxu2 %v707_v30 }
 0x1c8   : > { %784 = vmatpush.msrb.mxu3 %v729_v13  ;;  %814 = vmatpush.msra.mxu0 %v738_v34 }
 0x1c9   : > { %1042 = vmatpush.msra.mxu1 %v744_v14  ;;  %768 = vmatpush.msrb.mxu2 %v706_v35 }
 0x1ca   : > { %785 = vmatpush.msrb.mxu3 %v728_v16  ;;  %815 = vmatpush.msra.mxu0 %v737_v37 }
 0x1cb   : > { %1043 = vmatpush.msra.mxu1 %v743_v17  ;;  %769 = vmatpush.msrb.mxu2 %v705_v38 }
 0x1cc   : > { %786 = vmatpush.msrb.mxu3 %v727_v19 }
 0x1cd   : > { %1044 = vmatpush.msra.mxu1 %v742_v20 }
 0x1ce   : > { %787 = vmatpush.msrb.mxu3 %v726_v22 }
 0x1cf   : > { %1045 = vmatpush.msra.mxu1 %v741_v23 }
 0x1d0   : > { %788 = vmatpush.msrb.mxu3 %v725_v25 }
 0x1d1   : > { %1046 = vmatpush.msra.mxu1 %v740_v26 }
 0x1d2   : > { %789 = vmatpush.msrb.mxu3 %v724_v28 }
 0x1d3   : > { %1047 = vmatpush.msra.mxu1 %v739_v29 }
 0x1d4   : > { %790 = vmatpush.msrb.mxu3 %v723_v32 }
 0x1d5   : > { %1048 = vmatpush.msra.mxu1 %v738_v34 }
 0x1d6   : > { %791 = vmatpush.msrb.mxu3 %v722_v36 }
 0x1d7   : > { %1049 = vmatpush.msra.mxu1 %v737_v37 }
 0x1d8   : > { %792 = vmatpush.msrb.mxu3 %v721_v39 }
 0x225   : > { %v551_v0 = vpop.xlane.xlu0 %550 }
 0x22d   : > { %v554_v1 = vpop.xlane.xlu0 %553 }
 0x22e   : > { %v827_v44 = vmax.f32 %v551_v0, %v554_v1 }
 0x230   : > { %v828_v2 = vrot.slane %v827_v44, 4 }
 0x232   : > { %v829_v3 = vmax.f32 %v827_v44, %v828_v2 }
 0x234   : > { %v543_v45 = vpop.f32.mrf.mxu3  ;;  %v830_v46 = vrot.slane %v829_v3, 2 }
 0x235   : > { %v558_v47 = vrot.slane %v543_v45, 6  ;;  %v565_v48 = vrot.slane %v543_v45, 7  ;;  %682 = vmatmul.f32.vlgmr.msrb.gmra.mxu1 %v543_v45 }
 0x236   : > { %v831_v4 = vmax.f32 %v829_v3, %v830_v46 }
 0x237   : > { %1020 = vmatmul.msk.f32.vlgmr.msra.gmra.mxu3 %vm1597_vm9, %v558_v47  ;;  %1022 = vmatmul.msk.f32.vlgmr.msrb.gmra.mxu0 %vm1602_vm10, %v565_v48 }
 0x238   : > { %v832_v5 = vrot.slane %v831_v4, 1 }
 0x23a   : > { %v833_v6 = vmax.f32 %v831_v4, %v832_v5 }
 0x23c   : > { %v546_v49 = vpop.f32.mrf.mxu3  ;;  %v834_v7 = vsub.f32 %v551_v0, %v833_v6  ;;  %v835_v8 = vsub.f32 %v554_v1, %v833_v6 }
 0x23d   : > { %v559_v50 = vrot.slane %v546_v49, 6  ;;  %v566_v51 = vrot.slane %v546_v49, 7  ;;  %685 = vmatmul.f32.gmra.mxu1 %v546_v49 }
 0x23e   : > { %v836_v9 = vmul.f32 1.442695, %v834_v7  ;;  %v838_v10 = vmul.f32 1.442695, %v835_v8 }
 0x23f   : > { %v560_v52 = vsel %vm557_vm7, %v558_v47, %v559_v50  ;;  %v567_v53 = vsel %vm564_vm8, %v565_v48, %v566_v51 }
 0x240   : > { %639 = vmatmul.f32.gmra.mxu3 %v560_v52  ;;  %662 = vmatmul.f32.gmra.mxu0 %v567_v53  ;;  %1149 = vpow2.f32 %v836_v9 }
 0x241   : > { %1151 = vpow2.f32 %v838_v10 }
 0x246   : > { %v1150_v11 = vpop.eup %1149 }
 0x247   : > { %v1152_v12 = vpop.eup %1151 }
 0x248   : > { %v840_v13 = vadd.f32 %v1152_v12, %v1150_v11 }
 0x24a   : > { %v841_v14 = vrot.slane %v840_v13, 4 }
 0x24c   : > { %v842_v15 = vadd.f32 %v841_v14, %v840_v13 }
 0x24e   : > { %v843_v16 = vrot.slane %v842_v15, 2 }
 0x250   : > { %v844_v17 = vadd.f32 %v843_v16, %v842_v15 }
 0x252   : > { %v845_v18 = vrot.slane %v844_v17, 1 }
 0x254   : > { %v846_v19 = vadd.f32 %v845_v18, %v844_v17 }
 0x256   : > { %1153 = vrcp.f32 %v846_v19  ;;  %v858_v25 = vand.u32 2147483648, %v846_v19  ;;  %vm852_vm12 = vweird.f32 %v846_v19  ;;  %v856_v26 = vand.u32 2147483647, %v846_v19 }
 0x258   : > { %v859_v29 = vor.u32 1.1754944e-38, %v858_v25  ;;  %vm857_vm14 = vcmp.eq.f32.partialorder %v856_v26, 8.507059e+37 }
 0x25c   : > { %v1154_v20 = vpop.eup %1153 }
 0x25d   : > { %v848_v21 = vmul.f32 %v1154_v20, %v846_v19  ;;  %vm853_vm11 = vweird.f32 %v1154_v20 }
 0x25e   : > { %vm854_vm13 = vmor %vm852_vm12, %vm853_vm11 }
 0x25f   : > { %v849_v22 = vsub.f32 1.0, %v848_v21 }
 0x261   : > { %v850_v23 = vmul.f32 %v1154_v20, %v849_v22 }
 0x263   : > { %v851_v24 = vadd.f32 %v1154_v20, %v850_v23 }
 0x265   : > { %v855_v28 = vsel %vm854_vm13, %v1154_v20, %v851_v24 }
 0x266   : > { %v860_v34 = vsel %vm857_vm14, %v859_v29, %v855_v28 }
 0x267   : > { %v861_v38 = vmul.f32 %v1150_v11, %v860_v34 }
 0x2b2   : > { %v683_v47 = vpop.f32.mrf.mxu1 }
 0x2b4   : > { %v660_v43 = vpop.f32.mrf.mxu0 }
 0x2ba   : > { %v637_v41 = vpop.f32.mrf.mxu3  ;;  %v686_v57 = vpop.f32.mrf.mxu1 }
 0x2bb   : > { %v638_v45 = vadd.f32 %v637_v41, %v619_v40  ;;  %v863_v41 = vmul.f32 %v861_v38, %v1565_v31 }
 0x2bd   : > { %v661_v48 = vadd.f32 %v660_v43, %v638_v45  ;;  %v663_v55 = vpop.f32.mrf.mxu0 }
 0x2bf   : > { %v684_v49 = vadd.f32 %v683_v47, %v661_v48 }
 0x2c1   : > { %v689_v50 = vmax.f32 %v684_v49, 0.0 }
 0x2c3   : > { %v699_v51 = vrot.slane %v689_v50, 7  ;;  %v640_v52 = vpop.f32.mrf.mxu3  ;;  %816 = vmatmul.f32.vlgmr.msra.gmra.mxu0 %v689_v50  ;;  %v693_v53 = vrot.slane %v689_v50, 6 }
 0x2c4   : > { %v641_v54 = vadd.f32 %v640_v52, %v619_v40  ;;  %v862_v52 = vmul.f32 %v1152_v12, %v860_v34 }
 0x2c5   : > { %1024 = vmatmul.msk.f32.vlgmr.msrb.gmra.mxu2 %vm1597_vm9, %v693_v53  ;;  %1026 = vmatmul.msk.f32.vlgmr.msrb.gmra.mxu3 %vm1602_vm10, %v699_v51 }
 0x2c6   : > { %v664_v56 = vadd.f32 %v663_v55, %v641_v54  ;;  %v864_v54 = vmul.f32 %v862_v52, %v1570_v33 }
 0x2c8   : > { %v687_v58 = vadd.f32 %v686_v57, %v664_v56 }
 0x2ca   : > { %v690_v59 = vmax.f32 %v687_v58, 0.0 }
 0x2cc   : > { %819 = vmatmul.f32.vlgmr.msra.gmra.mxu1 %v690_v59  ;;  %v694_v60 = vrot.slane %v690_v59, 6  ;;  %v700_v61 = vrot.slane %v690_v59, 7 }
 0x2ce   : > { %v695_v62 = vsel %vm557_vm7, %v693_v53, %v694_v60  ;;  %v701_v63 = vsel %vm564_vm8, %v699_v51, %v700_v61 }
 0x2cf   : > { %773 = vmatmul.f32.gmra.mxu2 %v695_v62  ;;  %796 = vmatmul.f32.gmra.mxu3 %v701_v63 }
 0x340   : > { %v817_v37 = vpop.f32.mrf.mxu0 }
 0x348   : > { %v771_v30 = vpop.f32.mrf.mxu2  ;;  %v794_v35 = vpop.f32.mrf.mxu3 }
 0x349   : > { %v772_v32 = vadd.f32 %v771_v30, %v753_v27  ;;  %v820_v51 = vpop.f32.mrf.mxu1 }
 0x34b   : > { %v795_v36 = vadd.f32 %v794_v35, %v772_v32 }
 0x34d   : > { %v818_v39 = vadd.f32 %v817_v37, %v795_v36 }
 0x34f   : > { %v823_v40 = vmax.f32 %v818_v39, 0.0 }
 0x351   : > { %v865_v43 = vadd.f32 %v823_v40, %v1565_v31 }
 0x352   : > { %v774_v42 = vpop.f32.mrf.mxu2  ;;  %v797_v48 = vpop.f32.mrf.mxu3 }
 0x353   : > { %v867_v45 = vadd.f32 %v865_v43, %v863_v41  ;;  %v775_v47 = vadd.f32 %v774_v42, %v753_v27 }
 0x355   : > { %v869_v49 = vmax.f32 %v867_v45, 0.0  ;;  %v798_v50 = vadd.f32 %v797_v48, %v775_v47 }
 0x357   : > { %871 = vst [vmem:[%s308_s29] sm:$0xff] %v869_v49  ;;  %v821_v53 = vadd.f32 %v820_v51, %v798_v50 }
 0x359   : > { %v824_v31 = vmax.f32 %v821_v53, 0.0 }
 0x35b   : > { %v866_v55 = vadd.f32 %v824_v31, %v1570_v33 }
 0x35d   : > { %v868_v56 = vadd.f32 %v866_v55, %v864_v54 }
 0x35f   : > { %v870_v57 = vmax.f32 %v868_v56, 0.0 }
 0x361   : > { %872 = vst [vmem:[%s308_s29 + $0x8] sm:$0xff] %v870_v57 }
 0x362   : > { %1332 = shalt.err (!%p1329_p10)
}
 0x363   : > { %s1389_s6 = smov 128   ;;  %s1390_s17 = smov 8  }
 0x364   : > { %1068 = dma.vmem_to_hbm [thread:$0]  (%p1511_p3), %s887_s10, 256, %s889_s12, %s874_s22, %s1389_s6, %s1389_s6, %s1390_s17  }
 0x365 PF: > { %s903_s24 = sand.u32 1, %s1367_s18   ;;  %p1677_p12 = scmp.ge.s32.totalorder %s1379_s21, 2 }
 0x366   : > { %s904_s29 = scalar_lea.sflag [#allocation4], %s903_s24 }
 0x367   : > { %p1088_p13 = pnand %p1677_p12, %p1456_p6 }
 0x369   : > { %p1089_p0 = pneg %p1088_p13 }
 0x36b   : > { %1362 = dma.done.wait (%p1089_p0), %s904_s29, 256  }
 0x36c   : > { %1364 = vsyncadd (%p1089_p0), %s904_s29, 4294967040  ;;  %p20_p5 = scmp.ge.s32.totalorder %s1501_s11, 4   ;;  %s1678_s18 = smov %s1371_s19 }
 0x36d   : > { %s1679_s19 = smov %s1375_s20  ;;  %s1680_s20 = smov %s1517_s15 }
 0x36e   : > { %s1681_s21 = smov %s1501_s11  ;;  %22 = sbr.rel (!%p20_p5) target bundleno = 7 (0x7), region = 101 }
 0x373   :  { %910 = vsyncpa [#allocation3], 1 }
 0x374   :  { %912 = vsyncpa [#allocation3 + $0x1], 1 }
 0x375   :  { %913 = vsyncpa [#allocation6], 1 }
 0x376   :  { %914 = vsyncpa [#allocation9], 1 }
 0x377   :  { %915 = vsyncpa [#allocation4], 1 }
 0x378   :  { %917 = vsyncpa [#allocation4 + $0x1], 1 }

</bundles_post_ra>
